<compile_context>
chip_gen: v5e
topology: v5e:2x2
jax: 0.10.0
libtpu: 0.0.40
codegen_flags: <defaults>
</compile_context>

<pallas_src>
import jax
import jax.numpy as jnp
from jax import lax
from jax.experimental import pallas as pl
from jax.experimental.pallas import tpu as pltpu

IN_FEATURES = 784   # 1 * 28 * 28
HIDDEN = 128
OUT_FEATURES = 10
OUT_PAD = 128       # lane-dense padded output width
LN_EPS = 1e-5
DEFAULT_TB = 2048   # bf16 input: 2 bufs x 2048 x 784 x 2B ~ 6.1 MiB


def _round_up(n, m):
    return ((n + m - 1) // m) * m


def _cdiv(a, b):
    return (a + b - 1) // b


def _choose_tiling(B, tb):
    """Batch tile that (a) is a multiple of 8 sublanes, (b) keeps padding to
    < 8 rows whenever B is a multiple of 8 (no big jnp.pad copy), and
    (c) gives >= 2 grid steps for medium batches (v7x has 2 TensorCores)."""
    B8 = _round_up(max(B, 8), 8)
    if B8 <= tb:
        nt = 2 if B8 >= 16 else 1
    else:
        nt = _cdiv(B8, tb)
    TB = _round_up(_cdiv(B8, nt), 8)
    nt = _cdiv(B8, TB)
    return TB, nt, nt * TB


def linear_net_kernel(x_ref, w1_ref, b1_ref, w2_ref, b2_ref, o_ref):
    # ----- LayerNorm(784): one-pass stats in f32 on the VPU (biased variance,
    # torch-style). The affine (gamma, beta) is folded into w1/b1 in the wrapper.
    x = x_ref[...].astype(jnp.float32)                        # (TB, 784), bf16 -> f32
    inv_n = jnp.float32(1.0 / IN_FEATURES)
    s = jnp.sum(x, axis=-1, keepdims=True)
    s2 = jnp.sum(x * x, axis=-1, keepdims=True)
    mean = s * inv_n
    var = jnp.maximum(s2 * inv_n - mean * mean, 0.0)
    xn = (x - mean) * lax.rsqrt(var + LN_EPS)

    # ----- Linear(784 -> 128): bf16 operands into the MXU, f32 accumulation -----
    h = jnp.dot(xn.astype(jnp.bfloat16), w1_ref[...],
                preferred_element_type=jnp.float32) + b1_ref[...]

    # ----- GELU (exact, erf-based — matches nn.GELU default), f32 -----
    h = 0.5 * h * (1.0 + lax.erf(h * jnp.float32(0.7071067811865476)))

    # ----- Linear(128 -> 10), N padded to 128 lanes for dense MXU/stores -----
    y = jnp.dot(h.astype(jnp.bfloat16), w2_ref[...],
                preferred_element_type=jnp.float32) + b2_ref[...]

    o_ref[...] = y.astype(o_ref.dtype)                         # (TB, 128) bf16


def linear_net_forward(x_nchw, params, *, tb=DEFAULT_TB):
    B = x_nchw.shape[0]
    # Glue: flatten NCHW -> (B, 784), identical to torch.flatten(x, 1); cast to
    # bf16 so the kernel's dominant HBM stream is half-width.
    x2d = x_nchw.reshape(B, -1).astype(jnp.bfloat16)
    assert x2d.shape[1] == IN_FEATURES

    gamma, beta, w1, b1, w2, b2 = params

    TB, num_tiles, B_pad = _choose_tiling(B, tb)
    if B_pad != B:
        # At most a few rows (or one small tile) of zero padding; padded rows
        # flow to finite values and are sliced away below.
        x2d = jnp.pad(x2d, ((0, B_pad - B), (0, 0)))

    # Fold LayerNorm affine into fc1 (in f32, single bf16 cast afterwards):
    #   (xn * gamma + beta) @ w1 + b1 == xn @ (gamma[:,None] * w1) + (beta @ w1 + b1)
    gamma_f = gamma.astype(jnp.float32)
    beta_f = beta.astype(jnp.float32)
    w1_f = w1.astype(jnp.float32)
    w1_bf = (gamma_f[:, None] * w1_f).astype(jnp.bfloat16)            # (784, 128)
    b1_2 = (b1.astype(jnp.float32) + beta_f @ w1_f).reshape(1, HIDDEN)

    # fc2 padded to 128 output lanes.
    w2_pad = jnp.zeros((HIDDEN, OUT_PAD), jnp.bfloat16).at[:, :OUT_FEATURES].set(
        w2.astype(jnp.bfloat16))                                      # (128, 128)
    b2_pad = jnp.zeros((1, OUT_PAD), jnp.float32).at[:, :OUT_FEATURES].set(
        b2.reshape(1, OUT_FEATURES).astype(jnp.float32))

    weight_bytes = (IN_FEATURES * HIDDEN + HIDDEN * OUT_PAD) * 2 \
        + (HIDDEN + OUT_PAD) * 4
    cost = pl.CostEstimate(
        flops=2 * B_pad * (IN_FEATURES * HIDDEN + HIDDEN * OUT_PAD),
        transcendentals=B_pad * HIDDEN,
        bytes_accessed=B_pad * IN_FEATURES * 2 + B_pad * OUT_PAD * 2 + weight_bytes,
    )

    out = pl.pallas_call(
        linear_net_kernel,
        out_shape=jax.ShapeDtypeStruct((B_pad, OUT_PAD), jnp.bfloat16),
        grid=(num_tiles,),
        in_specs=[
            pl.BlockSpec((TB, IN_FEATURES), lambda i: (i, 0)),        # x tile (pipelined, bf16)
            pl.BlockSpec((IN_FEATURES, HIDDEN), lambda i: (0, 0)),    # fc1 weight (resident)
            pl.BlockSpec((1, HIDDEN), lambda i: (0, 0)),              # fc1 bias (+ folded LN)
            pl.BlockSpec((HIDDEN, OUT_PAD), lambda i: (0, 0)),        # fc2 weight (padded)
            pl.BlockSpec((1, OUT_PAD), lambda i: (0, 0)),             # fc2 bias (padded)
        ],
        out_specs=pl.BlockSpec((TB, OUT_PAD), lambda i: (i, 0)),
        compiler_params=pltpu.CompilerParams(
            dimension_semantics=("parallel",),
            vmem_limit_bytes=40 * 1024 * 1024,
        ),
        cost_estimate=cost,
    )(x2d, w1_bf, b1_2, w2_pad, b2_pad)

    return out[:B, :OUT_FEATURES].astype(jnp.float32)


def init_params(key):
    """Deterministic init matching PyTorch default shapes.

    fc weights are stored as (in, out) so the kernel computes x @ W directly
    (equivalent to torch's x @ weight.T with weight of shape (out, in)).
    """
    k1, k2, k3, k4 = jax.random.split(key, 4)
    bound1 = 1.0 / jnp.sqrt(IN_FEATURES)
    bound2 = 1.0 / jnp.sqrt(HIDDEN)
    gamma = jnp.ones((IN_FEATURES,), jnp.float32)   # LayerNorm weight
    beta = jnp.zeros((IN_FEATURES,), jnp.float32)   # LayerNorm bias
    w1 = jax.random.uniform(k1, (IN_FEATURES, HIDDEN), jnp.float32, -bound1, bound1)
    b1 = jax.random.uniform(k2, (HIDDEN,), jnp.float32, -bound1, bound1)
    w2 = jax.random.uniform(k3, (HIDDEN, OUT_FEATURES), jnp.float32, -bound2, bound2)
    b2 = jax.random.uniform(k4, (OUT_FEATURES,), jnp.float32, -bound2, bound2)
    return gamma, beta, w1, b1, w2, b2


if __name__ == "__main__":
    key = jax.random.PRNGKey(0)
    kx, kp = jax.random.split(key)

    # MNIST-style input implied by LayerNorm(784): (batch=2, C=1, 28, 28), NCHW.
    x = jax.random.normal(kx, (2, 1, 28, 28), jnp.float32)
    params = init_params(kp)

    out = linear_net_forward(x, params)
    jax.block_until_ready(out)
    assert out.shape == (2, OUT_FEATURES)

    # Pure-JAX f32 reference of the same math. The kernel uses bf16 activations
    # and bf16 MXU operands, so compare with a correspondingly relaxed tolerance.
    x2d = x.reshape(x.shape[0], -1)
    mean = jnp.mean(x2d, axis=-1, keepdims=True)
    var = jnp.mean((x2d - mean) ** 2, axis=-1, keepdims=True)
    xn = (x2d - mean) / jnp.sqrt(var + LN_EPS) * params[0] + params[1]
    h = xn @ params[2] + params[3]
    h = 0.5 * h * (1.0 + lax.erf(h / jnp.sqrt(2.0)))
    ref = h @ params[4] + params[5]
    assert jnp.allclose(out, ref, atol=3e-2, rtol=3e-2), "mismatch vs reference"

    print("KERNEL_OK")
</pallas_src>

<mosaic_0001>
module attributes {stable_mosaic.version = 11 : i64} {
  func.func @linear_net_kernel(%arg0: i32, %arg1: memref<8x784xbf16, #tpu.memory_space<vmem>>, %arg2: memref<784x128xbf16, #tpu.memory_space<vmem>>, %arg3: memref<1x128xf32, #tpu.memory_space<vmem>>, %arg4: memref<128x128xbf16, #tpu.memory_space<vmem>>, %arg5: memref<1x128xf32, #tpu.memory_space<vmem>>, %arg6: memref<8x128xbf16, #tpu.memory_space<vmem>>) attributes {dimension_semantics = [#tpu.dimension_semantics<parallel>], iteration_bounds = array<i64: 1>, scalar_prefetch = 0 : i64, scratch_operands = 0 : i64, tpu.core_type = #tpu.core_type<tc>, window_params = [{transform_indices = @transform_0, window_bounds = array<i64: 8, 784>}, {pipeline_mode = #tpu.pipeline_mode<synchronous>, transform_indices = @transform_1, window_bounds = array<i64: 784, 128>}, {pipeline_mode = #tpu.pipeline_mode<synchronous>, transform_indices = @transform_2, window_bounds = array<i64: 1, 128>}, {pipeline_mode = #tpu.pipeline_mode<synchronous>, transform_indices = @transform_3, window_bounds = array<i64: 128, 128>}, {pipeline_mode = #tpu.pipeline_mode<synchronous>, transform_indices = @transform_4, window_bounds = array<i64: 1, 128>}, {transform_indices = @transform_5, window_bounds = array<i64: 8, 128>}]} {
    %c0 = arith.constant 0 : index
    %c0_0 = arith.constant 0 : index
    %0 = vector.load %arg1[%c0, %c0_0] : memref<8x784xbf16, #tpu.memory_space<vmem>>, vector<8x784xbf16>
    %1 = arith.extf %0 : vector<8x784xbf16> to vector<8x784xf32>
    %cst = arith.constant dense<0.000000e+00> : vector<8xf32>
    %2 = vector.multi_reduction <add>, %1, %cst [1] : vector<8x784xf32> to vector<8xf32>
    %3 = vector.shape_cast %2 : vector<8xf32> to vector<8x1xf32>
    %4 = arith.mulf %1, %1 : vector<8x784xf32>
    %cst_1 = arith.constant dense<0.000000e+00> : vector<8xf32>
    %5 = vector.multi_reduction <add>, %4, %cst_1 [1] : vector<8x784xf32> to vector<8xf32>
    %6 = vector.shape_cast %5 : vector<8xf32> to vector<8x1xf32>
    %cst_2 = arith.constant 0.00127551018 : f32
    %7 = vector.broadcast %cst_2 : f32 to vector<8x1xf32>
    %8 = arith.mulf %3, %7 : vector<8x1xf32>
    %cst_3 = arith.constant 0.00127551018 : f32
    %9 = vector.broadcast %cst_3 : f32 to vector<8x1xf32>
    %10 = arith.mulf %6, %9 : vector<8x1xf32>
    %11 = arith.mulf %8, %8 : vector<8x1xf32>
    %12 = arith.subf %10, %11 : vector<8x1xf32>
    %cst_4 = arith.constant 0.000000e+00 : f32
    %13 = vector.broadcast %cst_4 : f32 to vector<8x1xf32>
    %14 = arith.maximumf %12, %13 : vector<8x1xf32>
    %15 = vector.broadcast %8 : vector<8x1xf32> to vector<8x784xf32>
    %16 = arith.subf %1, %15 : vector<8x784xf32>
    %cst_5 = arith.constant 9.99999974E-6 : f32
    %17 = vector.broadcast %cst_5 : f32 to vector<8x1xf32>
    %18 = arith.addf %14, %17 : vector<8x1xf32>
    %19 = math.rsqrt %18 : vector<8x1xf32>
    %20 = vector.broadcast %19 : vector<8x1xf32> to vector<8x784xf32>
    %21 = arith.mulf %16, %20 : vector<8x784xf32>
    %22 = arith.truncf %21 : vector<8x784xf32> to vector<8x784xbf16>
    %c0_6 = arith.constant 0 : index
    %c0_7 = arith.constant 0 : index
    %23 = vector.load %arg2[%c0_6, %c0_7] : memref<784x128xbf16, #tpu.memory_space<vmem>>, vector<784x128xbf16>
    %cst_8 = arith.constant dense<0.000000e+00> : vector<8x128xf32>
    %24 = tpu.matmul %22, %23, %cst_8 {dimension_numbers = #tpu.dot_dimension_numbers<[1], [0], [0], [1], [0, 0, 1, 1], [], []>} : vector<8x784xbf16>, vector<784x128xbf16>, vector<8x128xf32> -> vector<8x128xf32>
    %c0_9 = arith.constant 0 : index
    %c0_10 = arith.constant 0 : index
    %25 = vector.load %arg3[%c0_9, %c0_10] : memref<1x128xf32, #tpu.memory_space<vmem>>, vector<1x128xf32>
    %26 = vector.broadcast %25 : vector<1x128xf32> to vector<8x128xf32>
    %27 = arith.addf %24, %26 : vector<8x128xf32>
    %cst_11 = arith.constant 5.000000e-01 : f32
    %28 = vector.broadcast %cst_11 : f32 to vector<8x128xf32>
    %29 = arith.mulf %28, %27 : vector<8x128xf32>
    %cst_12 = arith.constant 0.707106769 : f32
    %30 = vector.broadcast %cst_12 : f32 to vector<8x128xf32>
    %31 = arith.mulf %27, %30 : vector<8x128xf32>
    %32 = math.erf %31 : vector<8x128xf32>
    %cst_13 = arith.constant 1.000000e+00 : f32
    %33 = vector.broadcast %cst_13 : f32 to vector<8x128xf32>
    %34 = arith.addf %33, %32 : vector<8x128xf32>
    %35 = arith.mulf %29, %34 : vector<8x128xf32>
    %36 = arith.truncf %35 : vector<8x128xf32> to vector<8x128xbf16>
    %c0_14 = arith.constant 0 : index
    %c0_15 = arith.constant 0 : index
    %37 = vector.load %arg4[%c0_14, %c0_15] : memref<128x128xbf16, #tpu.memory_space<vmem>>, vector<128x128xbf16>
    %cst_16 = arith.constant dense<0.000000e+00> : vector<8x128xf32>
    %38 = tpu.matmul %36, %37, %cst_16 {dimension_numbers = #tpu.dot_dimension_numbers<[1], [0], [0], [1], [0, 0, 1, 1], [], []>} : vector<8x128xbf16>, vector<128x128xbf16>, vector<8x128xf32> -> vector<8x128xf32>
    %c0_17 = arith.constant 0 : index
    %c0_18 = arith.constant 0 : index
    %39 = vector.load %arg5[%c0_17, %c0_18] : memref<1x128xf32, #tpu.memory_space<vmem>>, vector<1x128xf32>
    %40 = vector.broadcast %39 : vector<1x128xf32> to vector<8x128xf32>
    %41 = arith.addf %38, %40 : vector<8x128xf32>
    %42 = arith.truncf %41 : vector<8x128xf32> to vector<8x128xbf16>
    %c0_19 = arith.constant 0 : index
    %c0_20 = arith.constant 0 : index
    %43 = vector.load %arg6[%c0_19, %c0_20] : memref<8x128xbf16, #tpu.memory_space<vmem>>, vector<8x128xbf16>
    tpu.vector_store %arg6[%c0_19, %c0_20], %42 {strides = array<i32>} : memref<8x128xbf16, #tpu.memory_space<vmem>>, vector<8x128xbf16>,
    return
  }
  func.func @transform_0(%arg0: i32) -> (i32, i32) {
    %c0_i32 = arith.constant 0 : i32
    %c0_i32_0 = arith.constant 0 : i32
    return %arg0, %c0_i32 : i32, i32
  }
  func.func @transform_1(%arg0: i32) -> (i32, i32) {
    %c0_i32 = arith.constant 0 : i32
    %c0_i32_0 = arith.constant 0 : i32
    %c0_i32_1 = arith.constant 0 : i32
    return %c0_i32, %c0_i32_0 : i32, i32
  }
  func.func @transform_2(%arg0: i32) -> (i32, i32) {
    %c0_i32 = arith.constant 0 : i32
    %c0_i32_0 = arith.constant 0 : i32
    %c0_i32_1 = arith.constant 0 : i32
    return %c0_i32, %c0_i32_0 : i32, i32
  }
  func.func @transform_3(%arg0: i32) -> (i32, i32) {
    %c0_i32 = arith.constant 0 : i32
    %c0_i32_0 = arith.constant 0 : i32
    %c0_i32_1 = arith.constant 0 : i32
    return %c0_i32, %c0_i32_0 : i32, i32
  }
  func.func @transform_4(%arg0: i32) -> (i32, i32) {
    %c0_i32 = arith.constant 0 : i32
    %c0_i32_0 = arith.constant 0 : i32
    %c0_i32_1 = arith.constant 0 : i32
    return %c0_i32, %c0_i32_0 : i32, i32
  }
  func.func @transform_5(%arg0: i32) -> (i32, i32) {
    %c0_i32 = arith.constant 0 : i32
    %c0_i32_0 = arith.constant 0 : i32
    return %arg0, %c0_i32 : i32, i32
  }
}

</mosaic_0001>

<bundles_post_ra>
// kernel: tpu_custom_call.1
= control target key start
LH: loop header
LB: loop body
LE: loop exit
PB: predicated region body
PF: predicated region fallthrough
CT: control target
= control target key end

     0   :  { %10 = vsyncpa [#allocation3], 0  ;;  %s1277_s0 = inlined_call_operand.hbm [shape: bf16[8,784], index: 0, kind: input, shape index: {}]   ;;  %s1278_s1 = inlined_call_operand.hbm [shape: bf16[784,128], index: 1, kind: input, shape index: {}]   ;;  %s1279_s2 = inlined_call_operand.vmem [shape: f32[1,128], index: 2, kind: input, shape index: {}]   ;;  %s1280_s3 = inlined_call_operand.hbm [shape: bf16[128,128], index: 3, kind: input, shape index: {}]   ;;  %s1281_s4 = inlined_call_operand.vmem [shape: f32[1,128], index: 4, kind: input, shape index: {}]   ;;  %s1282_s5 = inlined_call_operand.hbm [shape: bf16[8,128], index: 5, kind: output, shape index: {}]  }
   0x1   :  { %11 = vsyncpa [#allocation6], 0  ;;  %s28_s20 = sshll.u32 %s1278_s1, 4  ;;  %s29_s20 = int_to_ptr.hbm [resolvable:$true] %s28_s20 }
   0x2   :  { %12 = vsyncpa [#allocation4], 0  ;;  %s1178_s21 = smov [#allocation5]   ;;  %s18_s25 = sshll.u32 %s1277_s0, 4  ;;  %s19_s25 = int_to_ptr.hbm [resolvable:$true] %s18_s25 }
   0x3   :  { %s30_s22 = sshll.u32 %s1178_s21, 4  ;;  %s1179_s26 = smov 64   ;;  %s31_s22 = int_to_ptr.vmem [resolvable:$true] %s30_s22 }
   0x4   :  { %s1180_s27 = smov 4   ;;  %s1181_s28 = smov [#allocation2]  }
   0x5   :  { %36 = dma.hbm_to_vmem [thread:$0]  %s29_s20, 6272, %s31_s22, [#allocation6], %s1179_s26, %s1179_s26, %s1180_s27  }
   0x6   :  { %s20_s29 = sshll.u32 %s1181_s28, 4  ;;  %s43_s7 = sshll.u32 %s1280_s3, 4  ;;  %s21_s29 = int_to_ptr.vmem [resolvable:$true] %s20_s29  ;;  %s44_s7 = int_to_ptr.hbm [resolvable:$true] %s43_s7 }
   0x7   :  { %23 = dma.hbm_to_vmem [thread:$0]  %s19_s25, 448, %s21_s29, [#allocation3]  }
   0x8   :  { %s1182_s1 = smov [#allocation7]  }
   0x9   :  { %s45_s8 = sshll.u32 %s1182_s1, 4  ;;  %s46_s8 = int_to_ptr.vmem [resolvable:$true] %s45_s8 }
   0xa   :  { %51 = dma.hbm_to_vmem [thread:$0]  %s44_s7, 1024, %s46_s8, [#allocation6], %s1179_s26, %s1179_s26, %s1180_s27  }
   0xb   :  { %1172 = dma.done.wait [#allocation3], 448  }
   0xc   :  { %1173 = vsyncadd [#allocation3], 4294966848 }
   0xd   :  { %1174 = dma.done.wait [#allocation6], 7296  }
   0xe   :  { %1175 = vsyncadd [#allocation6], 4294960000  ;;  %v67_v0 = vld [vmem:[#allocation2] sm:$0xff]  ;;  %v68_v1 = vld [vmem:[#allocation2 + $0x8] sm:$0xff]  ;;  %vm83_vm0 = vcmask 130048   ;;  %s1183_s10 = smov [#allocation8]  }
   0xf   :  { %v1223_v2 = vunpack.c.l.bf16 %v67_v0  ;;  %v1225_v3 = vunpack.c.h.bf16 %v67_v0  ;;  %v1227_v4 = vunpack.c.l.bf16 %v68_v1  ;;  %v1014_v5 = vld [vmem:[#allocation5 + $0x38] sm:$0xff]  ;;  %v1229_v8 = vunpack.c.h.bf16 %v68_v1  ;;  %v1013_v14 = vld [vmem:[#allocation5 + $0x30] sm:$0xff]  ;;  %v1012_v36 = vld [vmem:[#allocation5 + $0x28] sm:$0xff]  ;;  %s764_s11 = sshll.u32 %s1183_s10, 4  ;;  %s766_s14 = sshll.u32 %s1282_s5, 4  ;;  %s765_s11 = int_to_ptr.vmem [resolvable:$true] %s764_s11  ;;  %s767_s14 = int_to_ptr.hbm [resolvable:$true] %s766_s14 }
  0x10   :  { %v1022_v6 = vld [vmem:[#allocation5 + $0x78] sm:$0xff]  ;;  %540 = vmatpush.bf16.msra.mxu0 %v1014_v5  ;;  %v1021_v15 = vld [vmem:[#allocation5 + $0x70] sm:$0xff]  ;;  %v1020_v37 = vld [vmem:[#allocation5 + $0x68] sm:$0xff] }
  0x11   :  { %v69_v7 = vld [vmem:[#allocation2 + $0x10] sm:$0xff]  ;;  %v70_v9 = vld [vmem:[#allocation2 + $0x18] sm:$0xf]  ;;  %v78_v10 = vadd.f32 %v1225_v3, %v1223_v2  ;;  %v88_v11 = vmul.f32 %v1223_v2, %v1223_v2  ;;  %v89_v12 = vmul.f32 %v1225_v3, %v1225_v3  ;;  %v90_v13 = vmul.f32 %v1227_v4, %v1227_v4  ;;  %553 = vmatpush.bf16.msra.mxu1 %v1022_v6  ;;  %v1011_v40 = vld [vmem:[#allocation5 + $0x20] sm:$0xff] }
  0x12   :  { %v1239_v16 = vunpack.c.l.bf16 %v69_v7  ;;  %v91_v18 = vmul.f32 %v1229_v8, %v1229_v8  ;;  %v1244_v20 = vunpack.c.l.bf16 %v70_v9  ;;  %v1246_v21 = vunpack.c.h.bf16 %v69_v7  ;;  %v1030_v38 = vld [vmem:[#allocation5 + $0xb8] sm:$0xff]  ;;  %v1019_v41 = vld [vmem:[#allocation5 + $0x60] sm:$0xff]  ;;  %v1029_v44 = vld [vmem:[#allocation5 + $0xb0] sm:$0xff] }
  0x13   :  { %v79_v17 = vadd.f32 %v78_v10, %v1227_v4  ;;  %v95_v19 = vadd.f32 %v89_v12, %v88_v11  ;;  %v1038_v39 = vld [vmem:[#allocation5 + $0xf8] sm:$0xff]  ;;  %566 = vmatpush.bf16.msra.mxu2 %v1030_v38  ;;  %v1037_v45 = vld [vmem:[#allocation5 + $0xf0] sm:$0xff]  ;;  %v1028_v48 = vld [vmem:[#allocation5 + $0xa8] sm:$0xff] }
  0x14   :  { %v92_v23 = vmul.f32 %v1239_v16, %v1239_v16  ;;  %541 = vmatpush.bf16.msra.mxu0 %v1013_v14  ;;  %v84_v27 = vsel %vm83_vm0, %v1244_v20, 0.0  ;;  %v93_v29 = vmul.f32 %v1246_v21, %v1246_v21  ;;  %v94_v31 = vmul.f32 %v1244_v20, %v1244_v20  ;;  %579 = vmatpush.bf16.msra.mxu3 %v1038_v39  ;;  %v1010_v42 = vld [vmem:[#allocation5 + $0x18] sm:$0xff]  ;;  %v1009_v46 = vld [vmem:[#allocation5 + $0x10] sm:$0xff]  ;;  %v1036_v49 = vld [vmem:[#allocation5 + $0xe8] sm:$0xff] }
  0x15   :  { %v80_v22 = vadd.f32 %v79_v17, %v1229_v8  ;;  %v96_v24 = vadd.f32 %v95_v19, %v90_v13  ;;  %554 = vmatpush.bf16.msra.mxu1 %v1021_v15  ;;  %v1018_v43 = vld [vmem:[#allocation5 + $0x58] sm:$0xff]  ;;  %v1017_v47 = vld [vmem:[#allocation5 + $0x50] sm:$0xff]  ;;  %v1008_v50 = vld [vmem:[#allocation5 + $0x8] sm:$0xff] }
  0x16   :  { %v100_v34 = vsel %vm83_vm0, %v94_v31, 0.0  ;;  %v1016_v51 = vld [vmem:[#allocation5 + $0x48] sm:$0xff]  ;;  %v1027_v52 = vld [vmem:[#allocation5 + $0xa0] sm:$0xff]  ;;  %v1026_v56 = vld [vmem:[#allocation5 + $0x98] sm:$0xff] }
  0x17   :  { %v81_v25 = vadd.f32 %v80_v22, %v1239_v16  ;;  %v97_v26 = vadd.f32 %v96_v24, %v91_v18  ;;  %567 = vmatpush.bf16.msra.mxu2 %v1029_v44  ;;  %v1035_v53 = vld [vmem:[#allocation5 + $0xe0] sm:$0xff]  ;;  %v1034_v57 = vld [vmem:[#allocation5 + $0xd8] sm:$0xff]  ;;  %v1025_v60 = vld [vmem:[#allocation5 + $0x90] sm:$0xff] }
  0x18   :  { %542 = vmatpush.bf16.msra.mxu0 %v1012_v36  ;;  %580 = vmatpush.bf16.msra.mxu3 %v1037_v45  ;;  %v1007_v54 = vld [vmem:[#allocation5] sm:$0xff]  ;;  %v1046_v58 = vld [vmem:[#allocation5 + $0x138] sm:$0xff]  ;;  %v1033_v61 = vld [vmem:[#allocation5 + $0xd0] sm:$0xff] }
  0x19   :  { %v82_v28 = vadd.f32 %v81_v25, %v1246_v21  ;;  %v98_v30 = vadd.f32 %v97_v26, %v92_v23  ;;  %555 = vmatpush.bf16.msra.mxu1 %v1020_v37  ;;  %v1015_v55 = vld [vmem:[#allocation5 + $0x40] sm:$0xff]  ;;  %v1054_v59 = vld [vmem:[#allocation5 + $0x178] sm:$0xff]  ;;  %v1045_v62 = vld [vmem:[#allocation5 + $0x130] sm:$0xff] }
  0x1a   :  { %v1053_v63 = vld [vmem:[#allocation5 + $0x170] sm:$0xff]  ;;  %v1024_v0 = vld [vmem:[#allocation5 + $0x88] sm:$0xff]  ;;  %v1023_v9 = vld [vmem:[#allocation5 + $0x80] sm:$0xff] }
  0x1b   :  { %v85_v32 = vadd.f32 %v84_v27, %v82_v28  ;;  %v99_v33 = vadd.f32 %v98_v30, %v93_v29  ;;  %568 = vmatpush.bf16.msra.mxu2 %v1028_v48  ;;  %v1032_v1 = vld [vmem:[#allocation5 + $0xc8] sm:$0xff]  ;;  %v1031_v10 = vld [vmem:[#allocation5 + $0xc0] sm:$0xff]  ;;  %v1042_v14 = vld [vmem:[#allocation5 + $0x118] sm:$0xff] }
  0x1c   :  { %543 = vmatpush.bf16.msra.mxu0 %v1011_v40  ;;  %581 = vmatpush.bf16.msra.mxu3 %v1036_v49  ;;  %v1044_v5 = vld [vmem:[#allocation5 + $0x128] sm:$0xff]  ;;  %v1043_v11 = vld [vmem:[#allocation5 + $0x120] sm:$0xff]  ;;  %v1050_v15 = vld [vmem:[#allocation5 + $0x158] sm:$0xff] }
  0x1d   :  { %86 = vadd.xlane.f32.xlu0 %v85_v32  ;;  %v101_v35 = vadd.f32 %v100_v34, %v99_v33  ;;  %556 = vmatpush.bf16.msra.mxu1 %v1019_v41  ;;  %v1052_v6 = vld [vmem:[#allocation5 + $0x168] sm:$0xff]  ;;  %v1051_v12 = vld [vmem:[#allocation5 + $0x160] sm:$0xff]  ;;  %v1041_v23 = vld [vmem:[#allocation5 + $0x110] sm:$0xff] }
  0x1e   :  { %v1055_v18 = vld [vmem:[#allocation5 + $0x180] sm:$0xff]  ;;  %v1049_v24 = vld [vmem:[#allocation5 + $0x150] sm:$0xff]  ;;  %v1040_v27 = vld [vmem:[#allocation5 + $0x108] sm:$0xff] }
  0x1f   :  { %569 = vmatpush.bf16.msra.mxu2 %v1027_v52  ;;  %v1048_v28 = vld [vmem:[#allocation5 + $0x148] sm:$0xff]  ;;  %v1039_v30 = vld [vmem:[#allocation5 + $0x100] sm:$0xff] }
  0x20   :  { %544 = vmatpush.bf16.msra.mxu0 %v1010_v42  ;;  %582 = vmatpush.bf16.msra.mxu3 %v1035_v53  ;;  %v1047_v31 = vld [vmem:[#allocation5 + $0x140] sm:$0xff] }
  0x21   :  { %557 = vmatpush.bf16.msra.mxu1 %v1018_v43 }
  0x23   :  { %570 = vmatpush.bf16.msra.mxu2 %v1026_v56 }
  0x24   :  { %545 = vmatpush.bf16.msra.mxu0 %v1009_v46  ;;  %583 = vmatpush.bf16.msra.mxu3 %v1034_v57 }
  0x25   :  { %102 = vadd.xlane.f32.xlu0 %v101_v35  ;;  %558 = vmatpush.bf16.msra.mxu1 %v1017_v47 }
  0x27   :  { %571 = vmatpush.bf16.msra.mxu2 %v1025_v60 }
  0x28   :  { %546 = vmatpush.bf16.msra.mxu0 %v1008_v50  ;;  %584 = vmatpush.bf16.msra.mxu3 %v1033_v61 }
  0x29   :  { %559 = vmatpush.bf16.msra.mxu1 %v1016_v51 }
  0x2b   :  { %572 = vmatpush.bf16.msra.mxu2 %v1024_v0 }
  0x2c   :  { %547 = vmatpush.bf16.msra.mxu0 %v1007_v54  ;;  %585 = vmatpush.bf16.msra.mxu3 %v1032_v1  ;;  %v1063_v1 = vld [vmem:[#allocation7 + $0x38] sm:$0xff] }
  0x2d   :  { %560 = vmatpush.bf16.msra.mxu1 %v1015_v55 }
  0x2f   :  { %573 = vmatpush.bf16.msra.mxu2 %v1023_v9 }
  0x30   :  { %592 = vmatpush.bf16.msrb.mxu0 %v1046_v58  ;;  %586 = vmatpush.bf16.msra.mxu3 %v1031_v10  ;;  %v1062_v10 = vld [vmem:[#allocation7 + $0x30] sm:$0xff] }
  0x31   :  { %605 = vmatpush.bf16.msrb.mxu1 %v1054_v59 }
  0x33   :  { %625 = vmatpush.bf16.msrb.mxu2 %v1055_v18 }
  0x34   :  { %593 = vmatpush.bf16.msrb.mxu0 %v1045_v62  ;;  %744 = vmatpush.bf16.msrb.mxu3 %v1063_v1 }
  0x35   :  { %606 = vmatpush.bf16.msrb.mxu1 %v1053_v63 }
  0x38   :  { %594 = vmatpush.bf16.msrb.mxu0 %v1044_v5  ;;  %745 = vmatpush.bf16.msrb.mxu3 %v1062_v10 }
  0x39   :  { %607 = vmatpush.bf16.msrb.mxu1 %v1052_v6 }
  0x3c   :  { %595 = vmatpush.bf16.msrb.mxu0 %v1043_v11 }
  0x3d   :  { %608 = vmatpush.bf16.msrb.mxu1 %v1051_v12 }
  0x40   :  { %596 = vmatpush.bf16.msrb.mxu0 %v1042_v14 }
  0x41   :  { %609 = vmatpush.bf16.msrb.mxu1 %v1050_v15 }
  0x44   :  { %597 = vmatpush.bf16.msrb.mxu0 %v1041_v23 }
  0x45   :  { %610 = vmatpush.bf16.msrb.mxu1 %v1049_v24 }
  0x48   :  { %598 = vmatpush.bf16.msrb.mxu0 %v1040_v27 }
  0x49   :  { %611 = vmatpush.bf16.msrb.mxu1 %v1048_v28 }
  0x4c   :  { %599 = vmatpush.bf16.msrb.mxu0 %v1039_v30  ;;  %v1058_v30 = vld [vmem:[#allocation7 + $0x10] sm:$0xff] }
  0x4d   :  { %612 = vmatpush.bf16.msrb.mxu1 %v1047_v31 }
  0x90   :  { %v87_v7 = vpop.xlane.xlu0 %86 }
  0x91   :  { %v104_v13 = vmul.f32 0.0012755102, %v87_v7 }
  0x93   :  { %v106_v19 = vmul.f32 %v104_v13, %v104_v13  ;;  %v109_v38 = vsub.f32 %v1223_v2, %v104_v13  ;;  %v110_v39 = vsub.f32 %v1225_v3, %v104_v13  ;;  %v111_v40 = vsub.f32 %v1227_v4, %v104_v13 }
  0x94   :  { %v112_v41 = vsub.f32 %v1229_v8, %v104_v13  ;;  %v113_v2 = vsub.f32 %v1239_v16, %v104_v13  ;;  %v114_v3 = vsub.f32 %v1246_v21, %v104_v13  ;;  %v115_v4 = vsub.f32 %v1244_v20, %v104_v13  ;;  %v1070_v16 = vld [vmem:[%s1279_s2] ss:$0 sm:$0xff]  ;;  %v1061_v13 = vld [vmem:[#allocation7 + $0x28] sm:$0xff] }
  0x95   :  { %746 = vmatpush.bf16.msrb.mxu3 %v1061_v13 }
  0x98   :  { %v103_v17 = vpop.xlane.xlu0 %102 }
  0x99   :  { %v105_v22 = vmul.f32 0.0012755102, %v103_v17 }
  0x9b   :  { %v107_v25 = vsub.f32 %v105_v22, %v106_v19  ;;  %v1060_v19 = vld [vmem:[#allocation7 + $0x20] sm:$0xff] }
  0x9c   :  { %747 = vmatpush.bf16.msrb.mxu3 %v1060_v19 }
  0x9d   :  { %v108_v26 = vmax.f32 %v107_v25, 0.0  ;;  %v1059_v25 = vld [vmem:[#allocation7 + $0x18] sm:$0xff] }
  0x9f   :  { %v116_v29 = vadd.f32 1e-05, %v108_v26 }
  0xa0   :  { %748 = vmatpush.bf16.msrb.mxu3 %v1059_v25 }
  0xa1   :  { %1072 = vrsqrt.f32 %v116_v29  ;;  %vm123_vm2 = vweird.f32 %v116_v29 }
  0xa4   :  { %749 = vmatpush.bf16.msrb.mxu3 %v1058_v30 }
  0xa7   :  { %v1073_v32 = vpop.eup %1072 }
  0xa8   :  { %v118_v33 = vmul.f32 %v1073_v32, %v116_v29  ;;  %vm124_vm1 = vweird.f32 %v1073_v32 }
  0xa9   :  { %vm125_vm3 = vmor %vm123_vm2, %vm124_vm1 }
  0xaa   :  { %v119_v34 = vmul.f32 %v1073_v32, %v118_v33  ;;  %v1057_v33 = vld [vmem:[#allocation7 + $0x8] sm:$0xff] }
  0xab   :  { %750 = vmatpush.bf16.msrb.mxu3 %v1057_v33 }
  0xac   :  { %v120_v35 = vmul.f32 0.5, %v119_v34 }
  0xae   :  { %v121_v36 = vsub.f32 1.5, %v120_v35 }
  0xb0   :  { %v122_v37 = vmul.f32 %v1073_v32, %v121_v36 }
  0xb2   :  { %v126_v42 = vsel %vm125_vm3, %v1073_v32, %v122_v37  ;;  %v1056_v37 = vld [vmem:[#allocation7] sm:$0xff] }
  0xb3   :  { %v127_v43 = vmul.f32 %v126_v42, %v109_v38  ;;  %v128_v44 = vmul.f32 %v126_v42, %v110_v39  ;;  %v129_v45 = vmul.f32 %v126_v42, %v111_v40  ;;  %v130_v46 = vmul.f32 %v126_v42, %v112_v41  ;;  %751 = vmatpush.bf16.msrb.mxu3 %v1056_v37 }
  0xb4   :  { %v131_v8 = vmul.f32 %v126_v42, %v113_v2  ;;  %v132_v51 = vmul.f32 %v126_v42, %v114_v3  ;;  %v133_v52 = vmul.f32 %v126_v42, %v115_v4 }
  0xb5   :  { %v134_v47 = vpack.c.bf16 %v127_v43, %v127_v43  ;;  %v135_v48 = vpack.c.bf16 %v128_v44, %v128_v44  ;;  %v136_v49 = vpack.c.bf16 %v129_v45, %v129_v45  ;;  %v137_v50 = vpack.c.bf16 %v130_v46, %v130_v46 }
  0xb6   :  { %v138_v53 = vpack.c.bf16 %v131_v8, %v131_v8  ;;  %v139_v54 = vpack.c.bf16 %v132_v51, %v132_v51  ;;  %v140_v55 = vpack.c.bf16 %v133_v52, %v133_v52 }
  0xb7   :  { %548 = vmatmul.bf16.vlgmr.msra.gmra.mxu0 %v134_v47  ;;  %561 = vmatmul.bf16.vlgmr.msra.gmra.mxu1 %v135_v48 }
  0xb8   :  { %574 = vmatmul.bf16.vlgmr.msra.gmra.mxu2 %v136_v49  ;;  %587 = vmatmul.bf16.vlgmr.msra.gmra.mxu3 %v137_v50 }
  0xc7   :  { %600 = vmatmul.bf16.vlgmr.msrb.gmra.mxu0 %v138_v53  ;;  %613 = vmatmul.bf16.vlgmr.msrb.gmra.mxu1 %v139_v54 }
  0xc8   :  { %973 = vmatmul.msk.bf16.vlgmr.msrb.gmra.mxu2 %vm83_vm0, %v140_v55 }
 0x134   :  { %v549_v56 = vpop.f32.mrf.mxu0  ;;  %v562_v57 = vpop.f32.mrf.mxu1 }
 0x135   :  { %v550_v58 = vadd.f32 %v1070_v16, %v549_v56 }
 0x137   :  { %v563_v61 = vadd.f32 %v562_v57, %v550_v58 }
 0x13b   :  { %v575_v21 = vpop.f32.mrf.mxu2  ;;  %v588_v59 = vpop.f32.mrf.mxu3 }
 0x13c   :  { %v551_v20 = vpop.f32.mrf.mxu0  ;;  %v564_v60 = vpop.f32.mrf.mxu1  ;;  %v576_v62 = vadd.f32 %v575_v21, %v563_v61 }
 0x13d   :  { %v1071_v20 = vld [vmem:[%s1281_s4] ss:$0 sm:$0xff] }
 0x13e   :  { %v589_v5 = vadd.f32 %v588_v59, %v576_v62 }
 0x143   :  { %v577_v63 = vpop.f32.mrf.mxu2  ;;  %v590_v0 = vpop.f32.mrf.mxu3 }
 0x144   :  { %v601_v6 = vpop.f32.mrf.mxu0  ;;  %v614_v7 = vpop.f32.mrf.mxu1 }
 0x145   :  { %v602_v9 = vadd.f32 %v601_v6, %v589_v5 }
 0x147   :  { %v615_v11 = vadd.f32 %v614_v7, %v602_v9 }
 0x14b   :  { %v627_v12 = vpop.f32.mrf.mxu2 }
 0x14c   :  { %v628_v14 = vadd.f32 %v627_v12, %v615_v11  ;;  %v603_v15 = vpop.f32.mrf.mxu0  ;;  %v616_v17 = vpop.f32.mrf.mxu1 }
 0x14e   :  { %v632_v18 = vmul.f32 0.70710677, %v628_v14  ;;  %v631_v16 = vmul.f32 0.5, %v628_v14 }
 0x150   :  { %v633_v22 = vmul.f32 %v632_v18, %v632_v18 }
 0x152   :  { %v634_v23 = vmin.f32 %v633_v22, 16.0 }
 0x153   :  { %v629_v24 = vpop.f32.mrf.mxu2 }
 0x154   :  { %v635_v26 = vmul.f32 2.1237322e-06, %v634_v23  ;;  %v646_v27 = vmul.f32 3.8918573e-05, %v634_v23 }
 0x156   :  { %v636_v28 = vadd.f32 0.00028619796, %v635_v26  ;;  %v647_v29 = vadd.f32 0.001143296, %v646_v27 }
 0x158   :  { %v637_v31 = vmul.f32 %v636_v28, %v634_v23  ;;  %v648_v32 = vmul.f32 %v647_v29, %v634_v23 }
 0x15a   :  { %v649_v34 = vadd.f32 0.014752088, %v648_v32  ;;  %v638_v35 = vadd.f32 0.0036580483, %v637_v31 }
 0x15c   :  { %v650_v36 = vmul.f32 %v649_v34, %v634_v23  ;;  %v639_v39 = vmul.f32 %v638_v35, %v634_v23 }
 0x15e   :  { %v651_v38 = vadd.f32 0.112945676, %v650_v36  ;;  %v640_v42 = vadd.f32 0.05243302, %v639_v39 }
 0x160   :  { %v652_v40 = vmul.f32 %v651_v38, %v634_v23  ;;  %v641_v45 = vmul.f32 %v640_v42, %v634_v23 }
 0x162   :  { %v653_v41 = vadd.f32 0.4994258, %v652_v40  ;;  %v642_v46 = vadd.f32 0.18741608, %v641_v45 }
 0x164   :  { %v654_v43 = vmul.f32 %v653_v41, %v634_v23  ;;  %v643_v48 = vmul.f32 %v642_v46, %v634_v23 }
 0x166   :  { %v655_v44 = vadd.f32 1.0, %v654_v43  ;;  %v644_v3 = vadd.f32 1.1283791, %v643_v48 }
 0x168   :  { %1074 = vrcp.f32 %v655_v44  ;;  %v667_v2 = vand.u32 2147483648, %v655_v44  ;;  %v665_v8 = vand.u32 2147483647, %v655_v44  ;;  %vm661_vm5 = vweird.f32 %v655_v44 }
 0x169   :  { %v645_v53 = vmul.f32 %v644_v3, %v632_v18 }
 0x16a   :  { %v668_v52 = vor.u32 1.1754944e-38, %v667_v2  ;;  %vm666_vm7 = vcmp.eq.f32.partialorder %v665_v8, 8.507059e+37 }
 0x16e   :  { %v1075_v47 = vpop.eup %1074 }
 0x16f   :  { %v657_v49 = vmul.f32 %v1075_v47, %v655_v44  ;;  %vm662_vm4 = vweird.f32 %v1075_v47 }
 0x170   :  { %vm663_vm6 = vmor %vm661_vm5, %vm662_vm4 }
 0x171   :  { %v658_v50 = vsub.f32 1.0, %v657_v49 }
 0x173   :  { %v659_v4 = vmul.f32 %v1075_v47, %v658_v50 }
 0x175   :  { %v660_v51 = vadd.f32 %v1075_v47, %v659_v4 }
 0x177   :  { %v664_v54 = vsel %vm663_vm6, %v1075_v47, %v660_v51 }
 0x178   :  { %v669_v55 = vsel %vm666_vm7, %v668_v52, %v664_v54 }
 0x179   :  { %v670_v56 = vmul.f32 %v669_v55, %v645_v53 }
 0x17b   :  { %v974_v57 = vclamps-f32 %v670_v56, 1.0 }
 0x17d   :  { %v673_v58 = vadd.f32 1.0, %v974_v57 }
 0x17f   :  { %v674_v21 = vmul.f32 %v673_v58, %v631_v16 }
 0x181   :  { %v675_v59 = vpack.c.bf16 %v674_v21, %v674_v21 }
 0x183   :  { %752 = vmatmul.bf16.vlgmr.msrb.gmra.mxu3 %v675_v59 }
 0x206   :  { %v753_v60 = vpop.f32.mrf.mxu3 }
 0x207   :  { %v754_v61 = vadd.f32 %v1071_v20, %v753_v60 }
 0x209   :  { %v757_v62 = vpack.c.bf16 %v754_v61, %v754_v61 }
 0x20b   :  { %758 = vst [vmem:[#allocation8] sm:$0xf] %v757_v62 }
 0x20c   :  { %769 = dma.vmem_to_hbm [thread:$0]  %s765_s11, 64, %s767_s14, [#allocation4]  }
 0x20e   :  { %v755_v63 = vpop.f32.mrf.mxu3 }
 0x20f   :  { %1176 = dma.done.wait [#allocation4], 64  }
 0x210   :  { %1177 = vsyncadd [#allocation4], 4294967232 }
 0x211   :  { %774 = vsyncpa [#allocation3], 1 }
 0x212   :  { %775 = vsyncpa [#allocation6], 1 }
 0x213   :  { %776 = vsyncpa [#allocation4], 1 }

</bundles_post_ra>
